<compile_context>
chip_gen: v5e
topology: v5e:2x2
jax: 0.10.0
libtpu: 0.0.40
codegen_flags: <defaults>
</compile_context>

<pallas_src>
import functools

import jax
import jax.numpy as jnp
from jax.experimental import pallas as pl
from jax.experimental.pallas import tpu as pltpu

LEAKY_SLOPE = 0.01  # F.leaky_relu default


def _generator_kernel(num_layers, *refs):
    """refs = (x_ref, z_ref, w0x, w0z, b0, w1, b1, ..., w_{L-1}, b_{L-1}, o_ref)."""
    x_ref, z_ref = refs[0], refs[1]
    o_ref = refs[-1]
    params = refs[2:-1]

    # ---- Layer 0: concat fused as two partial matmuls (bf16 MXU, f32 acc) ----
    w0x = params[0][...]                       # (x_dim, hidden) bf16
    w0z = params[1][...]                       # (z_dim, hidden) bf16
    b0 = params[2][...].astype(jnp.float32)    # (1, hidden), read once per step
    h = (jnp.dot(x_ref[...].astype(jnp.bfloat16), w0x,
                 preferred_element_type=jnp.float32)
         + jnp.dot(z_ref[...].astype(jnp.bfloat16), w0z,
                   preferred_element_type=jnp.float32)
         + b0)
    if num_layers > 1:
        # TODO(synk): dropout implemented in eval mode (identity); training-mode
        # dropout would use pltpu.prng_seed / pltpu.stateful_bernoulli.
        h = jnp.where(h > 0, h, LEAKY_SLOPE * h)   # leaky_relu in f32

    # ---- Remaining layers ----
    idx = 3
    for layer in range(1, num_layers):
        w = params[idx][...]                               # (in, out) bf16
        b = params[idx + 1][...].astype(jnp.float32)       # (1, out)
        idx += 2
        h = jnp.dot(h.astype(jnp.bfloat16), w,
                    preferred_element_type=jnp.float32) + b
        if layer < num_layers - 1:
            h = jnp.where(h > 0, h, LEAKY_SLOPE * h)

    o_ref[...] = h.astype(o_ref.dtype)


def generator_forward(x, z, weights, biases, *, block_batch=256):
    """Fused MLP forward.

    weights[i]: (in_i, out_i) float32; biases[i]: (1, out_i) float32.
    x: (B, x_dim), z: (B, z_dim); inp_dim = x_dim + z_dim must equal
    weights[0].shape[0].
    """
    batch, x_dim = x.shape
    _, z_dim = z.shape
    num_layers = len(weights)
    out_dim = weights[-1].shape[1]
    assert weights[0].shape[0] == x_dim + z_dim

    block_batch = min(block_batch, batch)
    assert batch % block_batch == 0, "batch must be a multiple of block_batch"
    grid = (batch // block_batch,)

    # Split first-layer weight rows to fuse the concat; cast weights to bf16
    # (halves HBM traffic + VMEM residency; MXU accumulates in f32).
    w0 = weights[0]
    params_flat = [
        w0[:x_dim].astype(jnp.bfloat16),
        w0[x_dim:].astype(jnp.bfloat16),
        biases[0].astype(jnp.float32),
    ]
    for w, b in zip(weights[1:], biases[1:]):
        params_flat += [w.astype(jnp.bfloat16), b.astype(jnp.float32)]

    in_specs = [
        pl.BlockSpec((block_batch, x_dim), lambda i: (i, 0)),
        pl.BlockSpec((block_batch, z_dim), lambda i: (i, 0)),
    ]
    for p in params_flat:
        # Full weight/bias resident, constant block index across the grid.
        in_specs.append(pl.BlockSpec(p.shape, lambda i: (0, 0)))
    out_spec = pl.BlockSpec((block_batch, out_dim), lambda i: (i, 0))

    kernel = functools.partial(_generator_kernel, num_layers)

    return pl.pallas_call(
        kernel,
        out_shape=jax.ShapeDtypeStruct((batch, out_dim), x.dtype),
        grid_spec=pltpu.PrefetchScalarGridSpec(
            num_scalar_prefetch=0,
            grid=grid,
            in_specs=in_specs,
            out_specs=out_spec,
        ),
        compiler_params=pltpu.CompilerParams(
            dimension_semantics=("parallel",)),   # batch blocks shard across TCs
    )(x, z, *params_flat)


def init_generator_params(key, inp_dim, out_dim, hidden, layers):
    """Deterministic parameter init matching the PyTorch module's shapes."""
    dims_in = [inp_dim] + [hidden] * (layers - 1)
    dims_out = [hidden] * (layers - 1) + [out_dim]
    weights, biases = [], []
    for i in range(layers):
        key, kw, kb = jax.random.split(key, 3)
        bound = 1.0 / jnp.sqrt(dims_in[i])
        w = jax.random.uniform(kw, (dims_in[i], dims_out[i]), jnp.float32,
                               minval=-bound, maxval=bound)
        b = jax.random.uniform(kb, (1, dims_out[i]), jnp.float32,
                               minval=-bound, maxval=bound)
        weights.append(w)
        biases.append(b)
    return weights, biases


def reference_forward(x, z, weights, biases):
    """Plain-JAX f32 reference mirroring the PyTorch forward (eval mode)."""
    h = jnp.concatenate([x, z], axis=1)
    L = len(weights)
    for i, (w, b) in enumerate(zip(weights, biases)):
        h = h @ w + b[0]
        if i < L - 1:
            h = jnp.where(h > 0, h, LEAKY_SLOPE * h)
    return h


if __name__ == "__main__":
    # Generator(inp_dim=128, out_dim=128, hidden=128, layers=3, drop=0.5) with
    # x_dim=64, z_dim=64 so cat([x, z]) has 128 features (lane-dense dims).
    batch, x_dim, z_dim = 256, 64, 64
    inp_dim, out_dim, hidden, layers = x_dim + z_dim, 128, 128, 3

    key = jax.random.PRNGKey(0)
    kx, kz, kp = jax.random.split(key, 3)
    x = jax.random.normal(kx, (batch, x_dim), jnp.float32)
    z = jax.random.normal(kz, (batch, z_dim), jnp.float32)
    weights, biases = init_generator_params(kp, inp_dim, out_dim, hidden, layers)

    # block_batch=128 -> grid=(2,): both v7x TensorCores get a batch block.
    out = generator_forward(x, z, weights, biases, block_batch=128)
    out = jax.block_until_ready(out)

    ref = reference_forward(x, z, weights, biases)
    assert out.shape == (batch, out_dim)
    # bf16 matmul inputs vs f32 reference -> ~1% relative error budget.
    assert jnp.allclose(out, ref, atol=5e-2, rtol=5e-2), "mismatch vs reference"

    print("KERNEL_OK")
</pallas_src>

<mosaic_0001>
module attributes {stable_mosaic.version = 11 : i64} {
  func.func @_generator_kernel(%arg0: i32, %arg1: memref<128x64xf32, #tpu.memory_space<vmem>>, %arg2: memref<128x64xf32, #tpu.memory_space<vmem>>, %arg3: memref<64x128xbf16, #tpu.memory_space<vmem>>, %arg4: memref<64x128xbf16, #tpu.memory_space<vmem>>, %arg5: memref<1x128xf32, #tpu.memory_space<vmem>>, %arg6: memref<128x128xbf16, #tpu.memory_space<vmem>>, %arg7: memref<1x128xf32, #tpu.memory_space<vmem>>, %arg8: memref<128x128xbf16, #tpu.memory_space<vmem>>, %arg9: memref<1x128xf32, #tpu.memory_space<vmem>>, %arg10: memref<128x128xf32, #tpu.memory_space<vmem>>) attributes {dimension_semantics = [#tpu.dimension_semantics<parallel>], iteration_bounds = array<i64: 2>, scalar_prefetch = 0 : i64, scratch_operands = 0 : i64, tpu.core_type = #tpu.core_type<tc>, window_params = [{transform_indices = @transform_0, window_bounds = array<i64: 128, 64>}, {transform_indices = @transform_1, window_bounds = array<i64: 128, 64>}, {pipeline_mode = #tpu.pipeline_mode<synchronous>, transform_indices = @transform_2, window_bounds = array<i64: 64, 128>}, {pipeline_mode = #tpu.pipeline_mode<synchronous>, transform_indices = @transform_3, window_bounds = array<i64: 64, 128>}, {pipeline_mode = #tpu.pipeline_mode<synchronous>, transform_indices = @transform_4, window_bounds = array<i64: 1, 128>}, {pipeline_mode = #tpu.pipeline_mode<synchronous>, transform_indices = @transform_5, window_bounds = array<i64: 128, 128>}, {pipeline_mode = #tpu.pipeline_mode<synchronous>, transform_indices = @transform_6, window_bounds = array<i64: 1, 128>}, {pipeline_mode = #tpu.pipeline_mode<synchronous>, transform_indices = @transform_7, window_bounds = array<i64: 128, 128>}, {pipeline_mode = #tpu.pipeline_mode<synchronous>, transform_indices = @transform_8, window_bounds = array<i64: 1, 128>}, {transform_indices = @transform_9, window_bounds = array<i64: 128, 128>}]} {
    %c0 = arith.constant 0 : index
    %c0_0 = arith.constant 0 : index
    %0 = vector.load %arg3[%c0, %c0_0] : memref<64x128xbf16, #tpu.memory_space<vmem>>, vector<64x128xbf16>
    %c0_1 = arith.constant 0 : index
    %c0_2 = arith.constant 0 : index
    %1 = vector.load %arg4[%c0_1, %c0_2] : memref<64x128xbf16, #tpu.memory_space<vmem>>, vector<64x128xbf16>
    %c0_3 = arith.constant 0 : index
    %c0_4 = arith.constant 0 : index
    %2 = vector.load %arg5[%c0_3, %c0_4] : memref<1x128xf32, #tpu.memory_space<vmem>>, vector<1x128xf32>
    %c0_5 = arith.constant 0 : index
    %c0_6 = arith.constant 0 : index
    %3 = vector.load %arg1[%c0_5, %c0_6] : memref<128x64xf32, #tpu.memory_space<vmem>>, vector<128x64xf32>
    %4 = arith.truncf %3 : vector<128x64xf32> to vector<128x64xbf16>
    %cst = arith.constant dense<0.000000e+00> : vector<128x128xf32>
    %5 = tpu.matmul %4, %0, %cst {dimension_numbers = #tpu.dot_dimension_numbers<[1], [0], [0], [1], [0, 0, 1, 1], [], []>} : vector<128x64xbf16>, vector<64x128xbf16>, vector<128x128xf32> -> vector<128x128xf32>
    %c0_7 = arith.constant 0 : index
    %c0_8 = arith.constant 0 : index
    %6 = vector.load %arg2[%c0_7, %c0_8] : memref<128x64xf32, #tpu.memory_space<vmem>>, vector<128x64xf32>
    %7 = arith.truncf %6 : vector<128x64xf32> to vector<128x64xbf16>
    %cst_9 = arith.constant dense<0.000000e+00> : vector<128x128xf32>
    %8 = tpu.matmul %7, %1, %cst_9 {dimension_numbers = #tpu.dot_dimension_numbers<[1], [0], [0], [1], [0, 0, 1, 1], [], []>} : vector<128x64xbf16>, vector<64x128xbf16>, vector<128x128xf32> -> vector<128x128xf32>
    %9 = arith.addf %5, %8 : vector<128x128xf32>
    %10 = vector.broadcast %2 : vector<1x128xf32> to vector<128x128xf32>
    %11 = arith.addf %9, %10 : vector<128x128xf32>
    %cst_10 = arith.constant 0.000000e+00 : f32
    %12 = vector.broadcast %cst_10 : f32 to vector<128x128xf32>
    %13 = arith.cmpf ogt, %11, %12 : vector<128x128xf32>
    %cst_11 = arith.constant 0.00999999977 : f32
    %14 = vector.broadcast %cst_11 : f32 to vector<128x128xf32>
    %15 = arith.mulf %14, %11 : vector<128x128xf32>
    %16 = arith.select %13, %11, %15 : vector<128x128xi1>, vector<128x128xf32>
    %c0_12 = arith.constant 0 : index
    %c0_13 = arith.constant 0 : index
    %17 = vector.load %arg6[%c0_12, %c0_13] : memref<128x128xbf16, #tpu.memory_space<vmem>>, vector<128x128xbf16>
    %c0_14 = arith.constant 0 : index
    %c0_15 = arith.constant 0 : index
    %18 = vector.load %arg7[%c0_14, %c0_15] : memref<1x128xf32, #tpu.memory_space<vmem>>, vector<1x128xf32>
    %19 = arith.truncf %16 : vector<128x128xf32> to vector<128x128xbf16>
    %cst_16 = arith.constant dense<0.000000e+00> : vector<128x128xf32>
    %20 = tpu.matmul %19, %17, %cst_16 {dimension_numbers = #tpu.dot_dimension_numbers<[1], [0], [0], [1], [0, 0, 1, 1], [], []>} : vector<128x128xbf16>, vector<128x128xbf16>, vector<128x128xf32> -> vector<128x128xf32>
    %21 = vector.broadcast %18 : vector<1x128xf32> to vector<128x128xf32>
    %22 = arith.addf %20, %21 : vector<128x128xf32>
    %cst_17 = arith.constant 0.000000e+00 : f32
    %23 = vector.broadcast %cst_17 : f32 to vector<128x128xf32>
    %24 = arith.cmpf ogt, %22, %23 : vector<128x128xf32>
    %cst_18 = arith.constant 0.00999999977 : f32
    %25 = vector.broadcast %cst_18 : f32 to vector<128x128xf32>
    %26 = arith.mulf %25, %22 : vector<128x128xf32>
    %27 = arith.select %24, %22, %26 : vector<128x128xi1>, vector<128x128xf32>
    %c0_19 = arith.constant 0 : index
    %c0_20 = arith.constant 0 : index
    %28 = vector.load %arg8[%c0_19, %c0_20] : memref<128x128xbf16, #tpu.memory_space<vmem>>, vector<128x128xbf16>
    %c0_21 = arith.constant 0 : index
    %c0_22 = arith.constant 0 : index
    %29 = vector.load %arg9[%c0_21, %c0_22] : memref<1x128xf32, #tpu.memory_space<vmem>>, vector<1x128xf32>
    %30 = arith.truncf %27 : vector<128x128xf32> to vector<128x128xbf16>
    %cst_23 = arith.constant dense<0.000000e+00> : vector<128x128xf32>
    %31 = tpu.matmul %30, %28, %cst_23 {dimension_numbers = #tpu.dot_dimension_numbers<[1], [0], [0], [1], [0, 0, 1, 1], [], []>} : vector<128x128xbf16>, vector<128x128xbf16>, vector<128x128xf32> -> vector<128x128xf32>
    %32 = vector.broadcast %29 : vector<1x128xf32> to vector<128x128xf32>
    %33 = arith.addf %31, %32 : vector<128x128xf32>
    %c0_24 = arith.constant 0 : index
    %c0_25 = arith.constant 0 : index
    %34 = vector.load %arg10[%c0_24, %c0_25] : memref<128x128xf32, #tpu.memory_space<vmem>>, vector<128x128xf32>
    tpu.vector_store %arg10[%c0_24, %c0_25], %33 {strides = array<i32>} : memref<128x128xf32, #tpu.memory_space<vmem>>, vector<128x128xf32>,
    return
  }
  func.func @transform_0(%arg0: i32) -> (i32, i32) {
    %c0_i32 = arith.constant 0 : i32
    %c0_i32_0 = arith.constant 0 : i32
    return %arg0, %c0_i32 : i32, i32
  }
  func.func @transform_1(%arg0: i32) -> (i32, i32) {
    %c0_i32 = arith.constant 0 : i32
    %c0_i32_0 = arith.constant 0 : i32
    return %arg0, %c0_i32 : i32, i32
  }
  func.func @transform_2(%arg0: i32) -> (i32, i32) {
    %c0_i32 = arith.constant 0 : i32
    %c0_i32_0 = arith.constant 0 : i32
    %c0_i32_1 = arith.constant 0 : i32
    return %c0_i32, %c0_i32_0 : i32, i32
  }
  func.func @transform_3(%arg0: i32) -> (i32, i32) {
    %c0_i32 = arith.constant 0 : i32
    %c0_i32_0 = arith.constant 0 : i32
    %c0_i32_1 = arith.constant 0 : i32
    return %c0_i32, %c0_i32_0 : i32, i32
  }
  func.func @transform_4(%arg0: i32) -> (i32, i32) {
    %c0_i32 = arith.constant 0 : i32
    %c0_i32_0 = arith.constant 0 : i32
    %c0_i32_1 = arith.constant 0 : i32
    return %c0_i32, %c0_i32_0 : i32, i32
  }
  func.func @transform_5(%arg0: i32) -> (i32, i32) {
    %c0_i32 = arith.constant 0 : i32
    %c0_i32_0 = arith.constant 0 : i32
    %c0_i32_1 = arith.constant 0 : i32
    return %c0_i32, %c0_i32_0 : i32, i32
  }
  func.func @transform_6(%arg0: i32) -> (i32, i32) {
    %c0_i32 = arith.constant 0 : i32
    %c0_i32_0 = arith.constant 0 : i32
    %c0_i32_1 = arith.constant 0 : i32
    return %c0_i32, %c0_i32_0 : i32, i32
  }
  func.func @transform_7(%arg0: i32) -> (i32, i32) {
    %c0_i32 = arith.constant 0 : i32
    %c0_i32_0 = arith.constant 0 : i32
    %c0_i32_1 = arith.constant 0 : i32
    return %c0_i32, %c0_i32_0 : i32, i32
  }
  func.func @transform_8(%arg0: i32) -> (i32, i32) {
    %c0_i32 = arith.constant 0 : i32
    %c0_i32_0 = arith.constant 0 : i32
    %c0_i32_1 = arith.constant 0 : i32
    return %c0_i32, %c0_i32_0 : i32, i32
  }
  func.func @transform_9(%arg0: i32) -> (i32, i32) {
    %c0_i32 = arith.constant 0 : i32
    %c0_i32_0 = arith.constant 0 : i32
    return %arg0, %c0_i32 : i32, i32
  }
}

</mosaic_0001>

<bundles_post_ra>
// kernel: tpu_custom_call.1
= control target key start
LH: loop header
LB: loop body
LE: loop exit
PB: predicated region body
PF: predicated region fallthrough
CT: control target
= control target key end

     0   :  { %14 = vsyncpa [#allocation3], 0  ;;  %s1678_s0 = inlined_call_operand.vmem [shape: f32[256,64], index: 0, kind: input, shape index: {}]   ;;  %s1679_s1 = inlined_call_operand.vmem [shape: f32[256,64], index: 1, kind: input, shape index: {}]   ;;  %s1680_s2 = inlined_call_operand.vmem [shape: bf16[64,128], index: 2, kind: input, shape index: {}]   ;;  %s1681_s3 = inlined_call_operand.vmem [shape: bf16[64,128], index: 3, kind: input, shape index: {}]   ;;  %s1682_s4 = inlined_call_operand.vmem [shape: f32[1,128], index: 4, kind: input, shape index: {}]   ;;  %s1683_s5 = inlined_call_operand.vmem [shape: bf16[128,128], index: 5, kind: input, shape index: {}]   ;;  %s1684_s6 = inlined_call_operand.vmem [shape: f32[1,128], index: 6, kind: input, shape index: {}]   ;;  %s1685_s7 = inlined_call_operand.vmem [shape: bf16[128,128], index: 7, kind: input, shape index: {}]   ;;  %s1686_s8 = inlined_call_operand.vmem [shape: f32[1,128], index: 8, kind: input, shape index: {}]   ;;  %s1687_s9 = inlined_call_operand.hbm [shape: f32[256,128], index: 9, kind: output, shape index: {}]  }
   0x1   :  { %16 = vsyncpa [#allocation3 + $0x1], 0  ;;  %s1399_s30 = smov 0   ;;  %s1401_s10 = smov 0  }
   0x2   :  { %s1403_s11 = smov 0   ;;  %s1405_s12 = smov 0  }
   0x3 LB: > { %s1420_s13 = sadd.s32 4294967295, %s1345_s12   ;;  %s1088_s14 = sadd.s32 4294967294, %s1345_s12   ;;  %s1345_s12 = sphi %s1405_s12, %s1695_s12   ;;  %s1341_s11 = sphi %s1403_s11, %s1694_s11   ;;  %s1337_s10 = sphi %s1401_s10, %s1693_s10   ;;  %s1333_s30 = sphi %s1399_s30, %s1692_s30  }
   0x4   : > { %s1424_s15 = sadd.s32 1, %s1345_s12   ;;  %s228_s16 = sadd.s32 1, %s1341_s11 }
   0x5   : > { %s225_s17 = ssub.s32 %s1345_s12, %s1424_s15  ;;  %p238_p0 = scmp.ne.s32.totalorder %s1341_s11, %s1337_s10 }
   0x6   : > { %p226_p1 = scmp.eq.s32.totalorder %s225_s17, 0  ;;  %p239_p2 = scmp.eq.s32.totalorder %s1420_s13, 1 }
   0x7   : > { %p244_p3 = scmp.ne.s32.totalorder %s1337_s10, %s1333_s30  ;;  %p245_p4 = scmp.eq.s32.totalorder %s1088_s14, 1 }
   0x8   : > { %s1435_s18 = scalar_select %p226_p1, %s1341_s11, %s228_s16  }
   0x9   : > { %p1437_p5 = por %p239_p2, %p238_p0  ;;  %p1441_p6 = por %p245_p4, %p244_p3 }
   0xa   : > { %1688 = sst [smem:[#allocation5_spill]] %s1435_s18  ;;  %p1091_p7 = scmp.ge.s32.totalorder %s1345_s12, 1 }
   0xb   : > { %p302_p8 = scmp.lt.s32.totalorder %s1345_s12, 3 }
   0xd   : > { %p303_p9 = pnand %p1091_p7, %p302_p8 }
   0xe   : > { %s1093_s25 = sshll.u32 (!%p303_p9), %s1420_s13, 4  ;;  %s340_s17 = sand.u32 (!%p303_p9), 1, %s1337_s10  }
   0xf   : > { %306 = sbr.rel (%p303_p9) target bundleno = 585 (0x249), region = 56  ;;  %p344_p10 = scmp.lt.s32.totalorder (!%p303_p9), %s1093_s25, 31 }
  0x10   : > { %s1092_s18 = sshll.u32 (!%p303_p9), %s340_s17, 7  ;;  %s1238_s23 = sshll.u32 (!%p303_p9), %s1420_s13, 7 }
  0x11   : > { %s1626_s22 = scalar_lea.vmem (!%p303_p9), [#allocation2], %s1092_s18  ;;  %s999_s29 = scalar_lea.sflag (!%p303_p9), [#allocation3], %s340_s17 }
  0x12   : > { %s1303_s21 = scalar_lea.hbm (!%p303_p9), %s1687_s9, 256 }
  0x14   : > { %v1221_v0 = vld [vmem:[%s1681_s3 + $0x18] sm:$0xff]  ;;  %v1220_v2 = vld [vmem:[%s1681_s3 + $0x10] sm:$0xff]  ;;  %s1697_s25 = smov (!%p344_p10, %s1093_s25), 31  ;;  %v1219_v4 = vld [vmem:[%s1681_s3 + $0x8] sm:$0xff]  ;;  %vm446_vm0 = vcmask 523264  }
  0x15   : > { %v1217_v1 = vld [vmem:[%s1680_s2 + $0x18] sm:$0xff]  ;;  %475 = vmatpush.bf16.msra.mxu0 %v1221_v0  ;;  %v1216_v3 = vld [vmem:[%s1680_s2 + $0x10] sm:$0xff]  ;;  %s1094_s14 = sshll.u32 %s1697_s25, 3  ;;  %v1215_v5 = vld [vmem:[%s1680_s2 + $0x8] sm:$0xff] }
  0x16   : > { %572 = vmatpush.bf16.msra.mxu1 %v1217_v1  ;;  %s1469_s26 = scalar_lea.vmem %s1679_s1, %s1094_s14  ;;  %s1474_s25 = scalar_lea.vmem %s1678_s0, %s1094_s14  ;;  %v1218_v6 = vld [vmem:[%s1681_s3] sm:$0xff]  ;;  %v1229_v44 = vld [vmem:[%s1683_s5 + $0x38] sm:$0xff]  ;;  %v1228_v45 = vld [vmem:[%s1683_s5 + $0x30] sm:$0xff] }
  0x17   : > { %v1214_v7 = vld [vmem:[%s1680_s2] sm:$0xff]  ;;  %v399_v9 = vld [vmem:[%s1469_s26 + $0x8] sm:$0xff]  ;;  %v400_v14 = vld [vmem:[%s1469_s26 + $0x10] sm:$0xff]  ;;  %760 = vmatpush.bf16.msra.mxu2 %v1229_v44 }
  0x18   : > { %v398_v8 = vld [vmem:[%s1469_s26] sm:$0xff]  ;;  %v375_v11 = vld [vmem:[%s1474_s25 + $0x8] sm:$0xff]  ;;  %v401_v15 = vld [vmem:[%s1469_s26 + $0x18] sm:$0xff] }
  0x19   : > { %476 = vmatpush.bf16.msra.mxu0 %v1220_v2  ;;  %v374_v10 = vld [vmem:[%s1474_s25] sm:$0xff]  ;;  %v414_v12 = vpack.c.bf16 %v399_v9, %v398_v8  ;;  %v376_v16 = vld [vmem:[%s1474_s25 + $0x10] sm:$0xff]  ;;  %v377_v17 = vld [vmem:[%s1474_s25 + $0x18] sm:$0xff]  ;;  %v415_v18 = vpack.c.bf16 %v401_v15, %v400_v14 }
  0x1a   : > { %573 = vmatpush.bf16.msra.mxu1 %v1216_v3  ;;  %v390_v13 = vpack.c.bf16 %v375_v11, %v374_v10  ;;  %v391_v19 = vpack.c.bf16 %v377_v17, %v376_v16  ;;  %v402_v20 = vld [vmem:[%s1469_s26 + $0x20] sm:$0xff]  ;;  %v403_v21 = vld [vmem:[%s1469_s26 + $0x28] sm:$0xff]  ;;  %v404_v26 = vld [vmem:[%s1469_s26 + $0x30] sm:$0xff] }
  0x1b   : > { %v378_v22 = vld [vmem:[%s1474_s25 + $0x20] sm:$0xff]  ;;  %v379_v23 = vld [vmem:[%s1474_s25 + $0x28] sm:$0xff]  ;;  %v416_v24 = vpack.c.bf16 %v403_v21, %v402_v20  ;;  %v405_v27 = vld [vmem:[%s1469_s26 + $0x38] sm:$0xff]  ;;  %761 = vmatpush.bf16.msra.mxu2 %v1228_v45 }
  0x1c   : > { %v392_v25 = vpack.c.bf16 %v379_v23, %v378_v22  ;;  %v380_v28 = vld [vmem:[%s1474_s25 + $0x30] sm:$0xff]  ;;  %v381_v29 = vld [vmem:[%s1474_s25 + $0x38] sm:$0xff]  ;;  %v417_v30 = vpack.c.bf16 %v405_v27, %v404_v26  ;;  %v406_v32 = vld [vmem:[%s1469_s26 + $0x40] sm:$0xff] }
  0x1d   : > { %477 = vmatpush.bf16.msra.mxu0 %v1219_v4  ;;  %v393_v31 = vpack.c.bf16 %v381_v29, %v380_v28  ;;  %v407_v33 = vld [vmem:[%s1469_s26 + $0x48] sm:$0xff]  ;;  %v382_v34 = vld [vmem:[%s1474_s25 + $0x40] sm:$0xff]  ;;  %v408_v38 = vld [vmem:[%s1469_s26 + $0x50] sm:$0xff] }
  0x1e   : > { %574 = vmatpush.bf16.msra.mxu1 %v1215_v5  ;;  %v383_v35 = vld [vmem:[%s1474_s25 + $0x48] sm:$0xff]  ;;  %v418_v36 = vpack.c.bf16 %v407_v33, %v406_v32  ;;  %v409_v39 = vld [vmem:[%s1469_s26 + $0x58] sm:$0xff]  ;;  %v384_v40 = vld [vmem:[%s1474_s25 + $0x50] sm:$0xff] }
  0x1f   : > { %v394_v37 = vpack.c.bf16 %v383_v35, %v382_v34  ;;  %v385_v41 = vld [vmem:[%s1474_s25 + $0x58] sm:$0xff]  ;;  %v419_v42 = vpack.c.bf16 %v409_v39, %v408_v38  ;;  %v1227_v46 = vld [vmem:[%s1683_s5 + $0x28] sm:$0xff]  ;;  %v410_v47 = vld [vmem:[%s1469_s26 + $0x60] sm:$0xff] }
  0x20   : > { %v395_v43 = vpack.c.bf16 %v385_v41, %v384_v40  ;;  %v411_v48 = vld [vmem:[%s1469_s26 + $0x68] sm:$0xff]  ;;  %v386_v49 = vld [vmem:[%s1474_s25 + $0x60] sm:$0xff]  ;;  %762 = vmatpush.bf16.msra.mxu2 %v1227_v46  ;;  %v1225_v54 = vld [vmem:[%s1683_s5 + $0x18] sm:$0xff] }
  0x21   : > { %478 = vmatpush.bf16.msra.mxu0 %v1218_v6  ;;  %v387_v50 = vld [vmem:[%s1474_s25 + $0x68] sm:$0xff]  ;;  %v1226_v51 = vld [vmem:[%s1683_s5 + $0x20] sm:$0xff]  ;;  %v420_v52 = vpack.c.bf16 %v411_v48, %v410_v47  ;;  %v1224_v55 = vld [vmem:[%s1683_s5 + $0x10] sm:$0xff] }
  0x22   : > { %575 = vmatpush.bf16.msra.mxu1 %v1214_v7  ;;  %v396_v53 = vpack.c.bf16 %v387_v50, %v386_v49  ;;  %v1223_v56 = vld [vmem:[%s1683_s5 + $0x8] sm:$0xff]  ;;  %v412_v57 = vld [vmem:[%s1469_s26 + $0x70] sm:$0xff]  ;;  %v413_v58 = vld [vmem:[%s1469_s26 + $0x78] sm:$0xff]  ;;  %s1010_s26 = scalar_lea.hbm %s1687_s9, %s1238_s23 }
  0x23   : > { %v388_v59 = vld [vmem:[%s1474_s25 + $0x70] sm:$0xff]  ;;  %v389_v60 = vld [vmem:[%s1474_s25 + $0x78] sm:$0xff]  ;;  %v1222_v61 = vld [vmem:[%s1683_s5] sm:$0xff]  ;;  %v421_v62 = vpack.c.bf16 %v413_v58, %v412_v57  ;;  %s1011_s25 = sshll.u32 %s1626_s22, 4  ;;  %s1013_s28 = sshll.u32 %s1010_s26, 4  ;;  %s1012_s25 = int_to_ptr.vmem [resolvable:$true] %s1011_s25  ;;  %s1014_s28 = int_to_ptr.hbm [resolvable:$true] %s1013_s28 }
  0x24   : > { %1113 = vmatmul.msk.bf16.vlgmr.msra.gmra.mxu0 %vm446_vm0, %v414_v12  ;;  %763 = vmatpush.bf16.msra.mxu2 %v1226_v51  ;;  %v397_v63 = vpack.c.bf16 %v389_v60, %v388_v59  ;;  %v1557_v3 = vld [vmem:[%s1682_s4] ss:$0 sm:$0xff]  ;;  %s1297_s16 = sshra.s32 %s1014_s28, 4  ;;  %s1298_s16 = int_to_ptr.hbm [resolvable:$true] %s1297_s16 }
  0x25   : > { %1137 = vmatmul.msk.bf16.vlgmr.msra.gmra.mxu1 %vm446_vm0, %v390_v13  ;;  %s1299_s13 = scalar_lea.hbm %s1298_s16, 128  ;;  %p1304_p0 = scmp.lt.s32.totalorder %s1298_s16, %s1687_s9 }
  0x26   : > { %p1300_p11 = scmp.ne.s32.totalorder %s1298_s16, %s1299_s13  ;;  %p1305_p1 = scmp.lt.s32.totalorder %s1303_s21, %s1299_s13 }
  0x28   : > { %764 = vmatpush.bf16.msra.mxu2 %v1225_v54  ;;  %p1301_p12 = pnand %p1300_p11, %p1437_p5  ;;  %p1306_p2 = por %p1305_p1, %p1304_p0 }
  0x2a   : > { %p1302_p13 = pneg %p1301_p12 }
  0x2c   : > { %765 = vmatpush.bf16.msra.mxu2 %v1224_v55  ;;  %p1307_p3 = pnand %p1306_p2, %p1302_p13 }
  0x30   : > { %766 = vmatpush.bf16.msra.mxu2 %v1223_v56 }
  0x34   : > { %1114 = vmatmul.msk.bf16.gmra.mxu0 %vm446_vm0, %v415_v18  ;;  %767 = vmatpush.bf16.msra.mxu2 %v1222_v61 }
  0x35   : > { %1138 = vmatmul.msk.bf16.gmra.mxu1 %vm446_vm0, %v391_v19 }
  0x44   : > { %1115 = vmatmul.msk.bf16.gmra.mxu0 %vm446_vm0, %v416_v24 }
  0x45   : > { %1139 = vmatmul.msk.bf16.gmra.mxu1 %vm446_vm0, %v392_v25 }
  0x54   : > { %1116 = vmatmul.msk.bf16.gmra.mxu0 %vm446_vm0, %v417_v30 }
  0x55   : > { %1140 = vmatmul.msk.bf16.gmra.mxu1 %vm446_vm0, %v393_v31 }
  0x64   : > { %1117 = vmatmul.msk.bf16.gmra.mxu0 %vm446_vm0, %v418_v36 }
  0x65   : > { %1141 = vmatmul.msk.bf16.gmra.mxu1 %vm446_vm0, %v394_v37 }
  0x74   : > { %1118 = vmatmul.msk.bf16.gmra.mxu0 %vm446_vm0, %v419_v42 }
  0x75   : > { %1142 = vmatmul.msk.bf16.gmra.mxu1 %vm446_vm0, %v395_v43 }
  0x84   : > { %1119 = vmatmul.msk.bf16.gmra.mxu0 %vm446_vm0, %v420_v52 }
  0x85   : > { %1143 = vmatmul.msk.bf16.gmra.mxu1 %vm446_vm0, %v396_v53 }
  0x94   : > { %1120 = vmatmul.msk.bf16.gmra.mxu0 %vm446_vm0, %v421_v62 }
  0x95   : > { %1144 = vmatmul.msk.bf16.gmra.mxu1 %vm446_vm0, %v397_v63 }
  0xa1   : > { %v480_v0 = vpop.f32.mrf.mxu0 }
  0xa2   : > { %v577_v1 = vpop.f32.mrf.mxu1 }
  0xa3   : > { %v578_v2 = vadd.f32 %v577_v1, %v480_v0 }
  0xa5   : > { %v620_v4 = vadd.f32 %v1557_v3, %v578_v2 }
  0xa7   : > { %v652_v9 = vmul.f32 0.01, %v620_v4  ;;  %vm636_vm1 = vcmp.gt.f32.partialorder %v620_v4, 0.0 }
  0xa9   : > { %v482_v5 = vpop.f32.mrf.mxu0  ;;  %v668_v11 = vsel %vm636_vm1, %v620_v4, %v652_v9 }
  0xaa   : > { %v579_v6 = vpop.f32.mrf.mxu1 }
  0xab   : > { %v580_v7 = vadd.f32 %v579_v6, %v482_v5 }
  0xad   : > { %v621_v8 = vadd.f32 %v1557_v3, %v580_v7 }
  0xaf   : > { %vm637_vm2 = vcmp.gt.f32.partialorder %v621_v8, 0.0  ;;  %v653_v10 = vmul.f32 0.01, %v621_v8 }
  0xb1   : > { %v669_v12 = vsel %vm637_vm2, %v621_v8, %v653_v10  ;;  %v485_v13 = vpop.f32.mrf.mxu0 }
  0xb2   : > { %v582_v14 = vpop.f32.mrf.mxu1  ;;  %v701_v15 = vpack.c.bf16 %v669_v12, %v668_v11 }
  0xb3   : > { %v583_v16 = vadd.f32 %v582_v14, %v485_v13 }
  0xb4   : > { %768 = vmatmul.bf16.vlgmr.msra.gmra.mxu2 %v701_v15 }
  0xb5   : > { %v622_v17 = vadd.f32 %v1557_v3, %v583_v16 }
  0xb7   : > { %v654_v22 = vmul.f32 0.01, %v622_v17  ;;  %vm638_vm3 = vcmp.gt.f32.partialorder %v622_v17, 0.0 }
  0xb9   : > { %v487_v18 = vpop.f32.mrf.mxu0  ;;  %v670_v24 = vsel %vm638_vm3, %v622_v17, %v654_v22 }
  0xba   : > { %v584_v19 = vpop.f32.mrf.mxu1 }
  0xbb   : > { %v585_v20 = vadd.f32 %v584_v19, %v487_v18  ;;  %v1237_v18 = vld [vmem:[%s1685_s7 + $0x38] sm:$0xff] }
  0xbc   : > { %933 = vmatpush.bf16.msra.mxu3 %v1237_v18 }
  0xbd   : > { %v623_v21 = vadd.f32 %v1557_v3, %v585_v20  ;;  %v1236_v20 = vld [vmem:[%s1685_s7 + $0x30] sm:$0xff] }
  0xbf   : > { %vm639_vm4 = vcmp.gt.f32.partialorder %v623_v21, 0.0  ;;  %v655_v23 = vmul.f32 0.01, %v623_v21 }
  0xc0   : > { %934 = vmatpush.bf16.msra.mxu3 %v1236_v20 }
  0xc1   : > { %v671_v25 = vsel %vm639_vm4, %v623_v21, %v655_v23  ;;  %v490_v26 = vpop.f32.mrf.mxu0 }
  0xc2   : > { %v587_v27 = vpop.f32.mrf.mxu1  ;;  %v702_v28 = vpack.c.bf16 %v671_v25, %v670_v24  ;;  %v1235_v24 = vld [vmem:[%s1685_s7 + $0x28] sm:$0xff] }
  0xc3   : > { %v588_v29 = vadd.f32 %v587_v27, %v490_v26 }
  0xc4   : > { %773 = vmatmul.bf16.gmra.mxu2 %v702_v28  ;;  %935 = vmatpush.bf16.msra.mxu3 %v1235_v24  ;;  %v1234_v28 = vld [vmem:[%s1685_s7 + $0x20] sm:$0xff] }
  0xc5   : > { %v624_v30 = vadd.f32 %v1557_v3, %v588_v29 }
  0xc7   : > { %v656_v35 = vmul.f32 0.01, %v624_v30  ;;  %vm640_vm5 = vcmp.gt.f32.partialorder %v624_v30, 0.0 }
  0xc8   : > { %936 = vmatpush.bf16.msra.mxu3 %v1234_v28 }
  0xc9   : > { %v492_v31 = vpop.f32.mrf.mxu0  ;;  %v672_v37 = vsel %vm640_vm5, %v624_v30, %v656_v35 }
  0xca   : > { %v589_v32 = vpop.f32.mrf.mxu1 }
  0xcb   : > { %v590_v33 = vadd.f32 %v589_v32, %v492_v31 }
  0xcd   : > { %v625_v34 = vadd.f32 %v1557_v3, %v590_v33 }
  0xcf   : > { %vm641_vm6 = vcmp.gt.f32.partialorder %v625_v34, 0.0  ;;  %v657_v36 = vmul.f32 0.01, %v625_v34 }
  0xd1   : > { %v673_v38 = vsel %vm641_vm6, %v625_v34, %v657_v36  ;;  %v495_v39 = vpop.f32.mrf.mxu0  ;;  %v1233_v36 = vld [vmem:[%s1685_s7 + $0x18] sm:$0xff] }
  0xd2   : > { %v592_v40 = vpop.f32.mrf.mxu1  ;;  %v703_v41 = vpack.c.bf16 %v673_v38, %v672_v37  ;;  %937 = vmatpush.bf16.msra.mxu3 %v1233_v36 }
  0xd3   : > { %v593_v42 = vadd.f32 %v592_v40, %v495_v39  ;;  %v1232_v40 = vld [vmem:[%s1685_s7 + $0x10] sm:$0xff] }
  0xd4   : > { %778 = vmatmul.bf16.gmra.mxu2 %v703_v41 }
  0xd5   : > { %v626_v43 = vadd.f32 %v1557_v3, %v593_v42 }
  0xd6   : > { %938 = vmatpush.bf16.msra.mxu3 %v1232_v40 }
  0xd7   : > { %v658_v48 = vmul.f32 0.01, %v626_v43  ;;  %vm642_vm7 = vcmp.gt.f32.partialorder %v626_v43, 0.0 }
  0xd9   : > { %v497_v44 = vpop.f32.mrf.mxu0  ;;  %v674_v50 = vsel %vm642_vm7, %v626_v43, %v658_v48 }
  0xda   : > { %v594_v45 = vpop.f32.mrf.mxu1 }
  0xdb   : > { %v595_v46 = vadd.f32 %v594_v45, %v497_v44  ;;  %v1231_v44 = vld [vmem:[%s1685_s7 + $0x8] sm:$0xff] }
  0xdc   : > { %939 = vmatpush.bf16.msra.mxu3 %v1231_v44 }
  0xdd   : > { %v627_v47 = vadd.f32 %v1557_v3, %v595_v46 }
  0xdf   : > { %vm643_vm8 = vcmp.gt.f32.partialorder %v627_v47, 0.0  ;;  %v659_v49 = vmul.f32 0.01, %v627_v47 }
  0xe1   : > { %v675_v51 = vsel %vm643_vm8, %v627_v47, %v659_v49  ;;  %v500_v52 = vpop.f32.mrf.mxu0  ;;  %v1230_v49 = vld [vmem:[%s1685_s7] sm:$0xff] }
  0xe2   : > { %v597_v53 = vpop.f32.mrf.mxu1  ;;  %v704_v54 = vpack.c.bf16 %v675_v51, %v674_v50  ;;  %940 = vmatpush.bf16.msra.mxu3 %v1230_v49 }
  0xe3   : > { %v598_v55 = vadd.f32 %v597_v53, %v500_v52 }
  0xe4   : > { %783 = vmatmul.bf16.gmra.mxu2 %v704_v54 }
  0xe5   : > { %v628_v56 = vadd.f32 %v1557_v3, %v598_v55 }
  0xe7   : > { %v660_v61 = vmul.f32 0.01, %v628_v56  ;;  %vm644_vm9 = vcmp.gt.f32.partialorder %v628_v56, 0.0 }
  0xe9   : > { %v502_v57 = vpop.f32.mrf.mxu0  ;;  %v676_v63 = vsel %vm644_vm9, %v628_v56, %v660_v61 }
  0xea   : > { %v599_v58 = vpop.f32.mrf.mxu1 }
  0xeb   : > { %v600_v59 = vadd.f32 %v599_v58, %v502_v57 }
  0xed   : > { %v629_v60 = vadd.f32 %v1557_v3, %v600_v59 }
  0xef   : > { %vm645_vm10 = vcmp.gt.f32.partialorder %v629_v60, 0.0  ;;  %v661_v62 = vmul.f32 0.01, %v629_v60 }
  0xf1   : > { %v677_v0 = vsel %vm645_vm10, %v629_v60, %v661_v62  ;;  %v505_v1 = vpop.f32.mrf.mxu0 }
  0xf2   : > { %v602_v2 = vpop.f32.mrf.mxu1  ;;  %v705_v4 = vpack.c.bf16 %v677_v0, %v676_v63 }
  0xf3   : > { %v603_v5 = vadd.f32 %v602_v2, %v505_v1 }
  0xf4   : > { %788 = vmatmul.bf16.gmra.mxu2 %v705_v4 }
  0xf5   : > { %v630_v6 = vadd.f32 %v1557_v3, %v603_v5 }
  0xf7   : > { %v662_v11 = vmul.f32 0.01, %v630_v6  ;;  %vm646_vm11 = vcmp.gt.f32.partialorder %v630_v6, 0.0 }
  0xf9   : > { %v507_v7 = vpop.f32.mrf.mxu0  ;;  %v678_v13 = vsel %vm646_vm11, %v630_v6, %v662_v11 }
  0xfa   : > { %v604_v8 = vpop.f32.mrf.mxu1 }
  0xfb   : > { %v605_v9 = vadd.f32 %v604_v8, %v507_v7 }
  0xfd   : > { %v631_v10 = vadd.f32 %v1557_v3, %v605_v9 }
  0xff   : > { %vm647_vm12 = vcmp.gt.f32.partialorder %v631_v10, 0.0  ;;  %v663_v12 = vmul.f32 0.01, %v631_v10 }
 0x101   : > { %v679_v14 = vsel %vm647_vm12, %v631_v10, %v663_v12  ;;  %v510_v15 = vpop.f32.mrf.mxu0 }
 0x102   : > { %v607_v16 = vpop.f32.mrf.mxu1  ;;  %v706_v17 = vpack.c.bf16 %v679_v14, %v678_v13 }
 0x103   : > { %v608_v19 = vadd.f32 %v607_v16, %v510_v15 }
 0x104   : > { %793 = vmatmul.bf16.gmra.mxu2 %v706_v17 }
 0x105   : > { %v632_v21 = vadd.f32 %v1557_v3, %v608_v19 }
 0x107   : > { %v664_v27 = vmul.f32 0.01, %v632_v21  ;;  %vm648_vm13 = vcmp.gt.f32.partialorder %v632_v21, 0.0 }
 0x109   : > { %v512_v22 = vpop.f32.mrf.mxu0  ;;  %v680_v30 = vsel %vm648_vm13, %v632_v21, %v664_v27 }
 0x10a   : > { %v609_v23 = vpop.f32.mrf.mxu1 }
 0x10b   : > { %v610_v25 = vadd.f32 %v609_v23, %v512_v22 }
 0x10d   : > { %v633_v26 = vadd.f32 %v1557_v3, %v610_v25 }
 0x10f   : > { %vm649_vm14 = vcmp.gt.f32.partialorder %v633_v26, 0.0  ;;  %v665_v29 = vmul.f32 0.01, %v633_v26 }
 0x111   : > { %v681_v31 = vsel %vm649_vm14, %v633_v26, %v665_v29  ;;  %v515_v32 = vpop.f32.mrf.mxu0 }
 0x112   : > { %v612_v33 = vpop.f32.mrf.mxu1  ;;  %v707_v34 = vpack.c.bf16 %v681_v31, %v680_v30 }
 0x113   : > { %v613_v35 = vadd.f32 %v612_v33, %v515_v32 }
 0x114   : > { %798 = vmatmul.bf16.gmra.mxu2 %v707_v34 }
 0x115   : > { %v634_v37 = vadd.f32 %v1557_v3, %v613_v35 }
 0x117   : > { %v666_v43 = vmul.f32 0.01, %v634_v37  ;;  %vm650_vm15 = vcmp.gt.f32.partialorder %v634_v37, 0.0 }
 0x119   : > { %v517_v38 = vpop.f32.mrf.mxu0  ;;  %v682_v46 = vsel %vm650_vm15, %v634_v37, %v666_v43 }
 0x11a   : > { %v614_v39 = vpop.f32.mrf.mxu1 }
 0x11b   : > { %v615_v41 = vadd.f32 %v614_v39, %v517_v38 }
 0x11d   : > { %v635_v42 = vadd.f32 %v1557_v3, %v615_v41  ;;  %v1602_v3 = vld [vmem:[%s1684_s6] ss:$0 sm:$0xff] }
 0x11f   : > { %vm651_vm0 = vcmp.gt.f32.partialorder %v635_v42, 0.0  ;;  %v667_v45 = vmul.f32 0.01, %v635_v42 }
 0x121   : > { %v683_v47 = vsel %vm651_vm0, %v635_v42, %v667_v45 }
 0x122   : > { %v708_v48 = vpack.c.bf16 %v683_v47, %v682_v46 }
 0x124   : > { %803 = vmatmul.bf16.gmra.mxu2 %v708_v48 }
 0x137   : > { %v769_v50 = vpop.f32.mrf.mxu2 }
 0x138   : > { %v770_v51 = vadd.f32 %v1602_v3, %v769_v50 }
 0x13a   : > { %v825_v53 = vmul.f32 0.01, %v770_v51  ;;  %vm809_vm1 = vcmp.gt.f32.partialorder %v770_v51, 0.0 }
 0x13c   : > { %v841_v56 = vsel %vm809_vm1, %v770_v51, %v825_v53 }
 0x13f   : > { %v771_v52 = vpop.f32.mrf.mxu2 }
 0x140   : > { %v772_v54 = vadd.f32 %v1602_v3, %v771_v52 }
 0x142   : > { %v826_v55 = vmul.f32 0.01, %v772_v54  ;;  %vm810_vm2 = vcmp.gt.f32.partialorder %v772_v54, 0.0 }
 0x144   : > { %v842_v57 = vsel %vm810_vm2, %v772_v54, %v826_v55 }
 0x145   : > { %v874_v58 = vpack.c.bf16 %v842_v57, %v841_v56 }
 0x147   : > { %v774_v59 = vpop.f32.mrf.mxu2  ;;  %941 = vmatmul.bf16.vlgmr.msra.gmra.mxu3 %v874_v58 }
 0x148   : > { %v775_v60 = vadd.f32 %v1602_v3, %v774_v59  ;;  %v1282_v59 = vld [vmem:[%s1686_s8] ss:$0 sm:$0xff] }
 0x14a   : > { %v827_v62 = vmul.f32 0.01, %v775_v60  ;;  %vm811_vm3 = vcmp.gt.f32.partialorder %v775_v60, 0.0 }
 0x14c   : > { %v843_v1 = vsel %vm811_vm3, %v775_v60, %v827_v62 }
 0x14f   : > { %v776_v61 = vpop.f32.mrf.mxu2 }
 0x150   : > { %v777_v63 = vadd.f32 %v1602_v3, %v776_v61 }
 0x152   : > { %v828_v0 = vmul.f32 0.01, %v777_v63  ;;  %vm812_vm4 = vcmp.gt.f32.partialorder %v777_v63, 0.0 }
 0x154   : > { %v844_v2 = vsel %vm812_vm4, %v777_v63, %v828_v0 }
 0x155   : > { %v875_v4 = vpack.c.bf16 %v844_v2, %v843_v1 }
 0x157   : > { %v779_v5 = vpop.f32.mrf.mxu2  ;;  %946 = vmatmul.bf16.gmra.mxu3 %v875_v4 }
 0x158   : > { %v780_v6 = vadd.f32 %v1602_v3, %v779_v5 }
 0x15a   : > { %v829_v8 = vmul.f32 0.01, %v780_v6  ;;  %vm813_vm5 = vcmp.gt.f32.partialorder %v780_v6, 0.0 }
 0x15c   : > { %v845_v11 = vsel %vm813_vm5, %v780_v6, %v829_v8 }
 0x15f   : > { %v781_v7 = vpop.f32.mrf.mxu2 }
 0x160   : > { %v782_v9 = vadd.f32 %v1602_v3, %v781_v7 }
 0x162   : > { %v830_v10 = vmul.f32 0.01, %v782_v9  ;;  %vm814_vm6 = vcmp.gt.f32.partialorder %v782_v9, 0.0 }
 0x164   : > { %v846_v12 = vsel %vm814_vm6, %v782_v9, %v830_v10 }
 0x165   : > { %v876_v13 = vpack.c.bf16 %v846_v12, %v845_v11 }
 0x167   : > { %v784_v14 = vpop.f32.mrf.mxu2  ;;  %951 = vmatmul.bf16.gmra.mxu3 %v876_v13 }
 0x168   : > { %v785_v15 = vadd.f32 %v1602_v3, %v784_v14 }
 0x16a   : > { %v831_v17 = vmul.f32 0.01, %v785_v15  ;;  %vm815_vm7 = vcmp.gt.f32.partialorder %v785_v15, 0.0 }
 0x16c   : > { %v847_v20 = vsel %vm815_vm7, %v785_v15, %v831_v17 }
 0x16f   : > { %v786_v16 = vpop.f32.mrf.mxu2 }
 0x170   : > { %v787_v18 = vadd.f32 %v1602_v3, %v786_v16 }
 0x172   : > { %v832_v19 = vmul.f32 0.01, %v787_v18  ;;  %vm816_vm8 = vcmp.gt.f32.partialorder %v787_v18, 0.0 }
 0x174   : > { %v848_v21 = vsel %vm816_vm8, %v787_v18, %v832_v19 }
 0x175   : > { %v877_v22 = vpack.c.bf16 %v848_v21, %v847_v20 }
 0x177   : > { %v789_v23 = vpop.f32.mrf.mxu2  ;;  %956 = vmatmul.bf16.gmra.mxu3 %v877_v22 }
 0x178   : > { %v790_v24 = vadd.f32 %v1602_v3, %v789_v23 }
 0x17a   : > { %v833_v26 = vmul.f32 0.01, %v790_v24  ;;  %vm817_vm9 = vcmp.gt.f32.partialorder %v790_v24, 0.0 }
 0x17c   : > { %v849_v29 = vsel %vm817_vm9, %v790_v24, %v833_v26 }
 0x17f   : > { %v791_v25 = vpop.f32.mrf.mxu2 }
 0x180   : > { %v792_v27 = vadd.f32 %v1602_v3, %v791_v25 }
 0x182   : > { %v834_v28 = vmul.f32 0.01, %v792_v27  ;;  %vm818_vm10 = vcmp.gt.f32.partialorder %v792_v27, 0.0 }
 0x184   : > { %v850_v30 = vsel %vm818_vm10, %v792_v27, %v834_v28 }
 0x185   : > { %v878_v31 = vpack.c.bf16 %v850_v30, %v849_v29 }
 0x187   : > { %v794_v32 = vpop.f32.mrf.mxu2  ;;  %961 = vmatmul.bf16.gmra.mxu3 %v878_v31 }
 0x188   : > { %v795_v33 = vadd.f32 %v1602_v3, %v794_v32 }
 0x18a   : > { %v835_v35 = vmul.f32 0.01, %v795_v33  ;;  %vm819_vm11 = vcmp.gt.f32.partialorder %v795_v33, 0.0 }
 0x18c   : > { %v851_v38 = vsel %vm819_vm11, %v795_v33, %v835_v35 }
 0x18f   : > { %v796_v34 = vpop.f32.mrf.mxu2 }
 0x190   : > { %v797_v36 = vadd.f32 %v1602_v3, %v796_v34 }
 0x192   : > { %v836_v37 = vmul.f32 0.01, %v797_v36  ;;  %vm820_vm12 = vcmp.gt.f32.partialorder %v797_v36, 0.0 }
 0x194   : > { %v852_v39 = vsel %vm820_vm12, %v797_v36, %v836_v37 }
 0x195   : > { %v879_v40 = vpack.c.bf16 %v852_v39, %v851_v38 }
 0x197   : > { %v799_v41 = vpop.f32.mrf.mxu2  ;;  %966 = vmatmul.bf16.gmra.mxu3 %v879_v40 }
 0x198   : > { %v800_v42 = vadd.f32 %v1602_v3, %v799_v41 }
 0x19a   : > { %v837_v44 = vmul.f32 0.01, %v800_v42  ;;  %vm821_vm13 = vcmp.gt.f32.partialorder %v800_v42, 0.0 }
 0x19c   : > { %v853_v47 = vsel %vm821_vm13, %v800_v42, %v837_v44 }
 0x19f   : > { %v801_v43 = vpop.f32.mrf.mxu2 }
 0x1a0   : > { %v802_v45 = vadd.f32 %v1602_v3, %v801_v43 }
 0x1a2   : > { %v838_v46 = vmul.f32 0.01, %v802_v45  ;;  %vm822_vm14 = vcmp.gt.f32.partialorder %v802_v45, 0.0 }
 0x1a4   : > { %v854_v48 = vsel %vm822_vm14, %v802_v45, %v838_v46 }
 0x1a5   : > { %v880_v49 = vpack.c.bf16 %v854_v48, %v853_v47 }
 0x1a7   : > { %v804_v50 = vpop.f32.mrf.mxu2  ;;  %971 = vmatmul.bf16.gmra.mxu3 %v880_v49 }
 0x1a8   : > { %v805_v51 = vadd.f32 %v1602_v3, %v804_v50 }
 0x1aa   : > { %v839_v53 = vmul.f32 0.01, %v805_v51  ;;  %vm823_vm15 = vcmp.gt.f32.partialorder %v805_v51, 0.0 }
 0x1ac   : > { %v855_v56 = vsel %vm823_vm15, %v805_v51, %v839_v53 }
 0x1af   : > { %v806_v52 = vpop.f32.mrf.mxu2 }
 0x1b0   : > { %v807_v54 = vadd.f32 %v1602_v3, %v806_v52 }
 0x1b2   : > { %v840_v55 = vmul.f32 0.01, %v807_v54  ;;  %vm824_vm0 = vcmp.gt.f32.partialorder %v807_v54, 0.0 }
 0x1b4   : > { %v856_v57 = vsel %vm824_vm0, %v807_v54, %v840_v55 }
 0x1b5   : > { %v881_v58 = vpack.c.bf16 %v856_v57, %v855_v56 }
 0x1b7   : > { %976 = vmatmul.bf16.gmra.mxu3 %v881_v58 }
 0x1ca   : > { %v942_v60 = vpop.f32.mrf.mxu3 }
 0x1cb   : > { %v943_v61 = vadd.f32 %v1282_v59, %v942_v60 }
 0x1cd   : > { %982 = vst [vmem:[%s1626_s22] sm:$0xff] %v943_v61 }
 0x1d2   : > { %v944_v3 = vpop.f32.mrf.mxu3 }
 0x1d3   : > { %v945_v62 = vadd.f32 %v1282_v59, %v944_v3 }
 0x1d5   : > { %983 = vst [vmem:[%s1626_s22 + $0x8] sm:$0xff] %v945_v62 }
 0x1da   : > { %v947_v63 = vpop.f32.mrf.mxu3 }
 0x1db   : > { %v948_v0 = vadd.f32 %v1282_v59, %v947_v63 }
 0x1dd   : > { %984 = vst [vmem:[%s1626_s22 + $0x10] sm:$0xff] %v948_v0 }
 0x1e2   : > { %v949_v1 = vpop.f32.mrf.mxu3 }
 0x1e3   : > { %v950_v2 = vadd.f32 %v1282_v59, %v949_v1 }
 0x1e5   : > { %985 = vst [vmem:[%s1626_s22 + $0x18] sm:$0xff] %v950_v2 }
 0x1ea   : > { %v952_v4 = vpop.f32.mrf.mxu3 }
 0x1eb   : > { %v953_v5 = vadd.f32 %v1282_v59, %v952_v4 }
 0x1ed   : > { %986 = vst [vmem:[%s1626_s22 + $0x20] sm:$0xff] %v953_v5 }
 0x1f2   : > { %v954_v6 = vpop.f32.mrf.mxu3 }
 0x1f3   : > { %v955_v7 = vadd.f32 %v1282_v59, %v954_v6 }
 0x1f5   : > { %987 = vst [vmem:[%s1626_s22 + $0x28] sm:$0xff] %v955_v7 }
 0x1fa   : > { %v957_v8 = vpop.f32.mrf.mxu3 }
 0x1fb   : > { %v958_v9 = vadd.f32 %v1282_v59, %v957_v8 }
 0x1fd   : > { %988 = vst [vmem:[%s1626_s22 + $0x30] sm:$0xff] %v958_v9 }
 0x202   : > { %v959_v10 = vpop.f32.mrf.mxu3 }
 0x203   : > { %v960_v11 = vadd.f32 %v1282_v59, %v959_v10 }
 0x205   : > { %989 = vst [vmem:[%s1626_s22 + $0x38] sm:$0xff] %v960_v11 }
 0x20a   : > { %v962_v12 = vpop.f32.mrf.mxu3 }
 0x20b   : > { %v963_v13 = vadd.f32 %v1282_v59, %v962_v12 }
 0x20d   : > { %990 = vst [vmem:[%s1626_s22 + $0x40] sm:$0xff] %v963_v13 }
 0x212   : > { %v964_v14 = vpop.f32.mrf.mxu3 }
 0x213   : > { %v965_v15 = vadd.f32 %v1282_v59, %v964_v14 }
 0x215   : > { %991 = vst [vmem:[%s1626_s22 + $0x48] sm:$0xff] %v965_v15 }
 0x21a   : > { %v967_v16 = vpop.f32.mrf.mxu3 }
 0x21b   : > { %v968_v17 = vadd.f32 %v1282_v59, %v967_v16 }
 0x21d   : > { %992 = vst [vmem:[%s1626_s22 + $0x50] sm:$0xff] %v968_v17 }
 0x222   : > { %v969_v18 = vpop.f32.mrf.mxu3 }
 0x223   : > { %v970_v19 = vadd.f32 %v1282_v59, %v969_v18 }
 0x225   : > { %993 = vst [vmem:[%s1626_s22 + $0x58] sm:$0xff] %v970_v19 }
 0x22a   : > { %v972_v20 = vpop.f32.mrf.mxu3 }
 0x22b   : > { %v973_v21 = vadd.f32 %v1282_v59, %v972_v20 }
 0x22d   : > { %994 = vst [vmem:[%s1626_s22 + $0x60] sm:$0xff] %v973_v21 }
 0x232   : > { %v974_v22 = vpop.f32.mrf.mxu3 }
 0x233   : > { %v975_v23 = vadd.f32 %v1282_v59, %v974_v22 }
 0x235   : > { %995 = vst [vmem:[%s1626_s22 + $0x68] sm:$0xff] %v975_v23 }
 0x23a   : > { %v977_v24 = vpop.f32.mrf.mxu3 }
 0x23b   : > { %v978_v25 = vadd.f32 %v1282_v59, %v977_v24 }
 0x23d   : > { %996 = vst [vmem:[%s1626_s22 + $0x70] sm:$0xff] %v978_v25 }
 0x242   : > { %v979_v26 = vpop.f32.mrf.mxu3 }
 0x243   : > { %v980_v27 = vadd.f32 %v1282_v59, %v979_v26 }
 0x245   : > { %997 = vst [vmem:[%s1626_s22 + $0x78] sm:$0xff] %v980_v27 }
 0x246   : > { %1310 = shalt.err (!%p1307_p3)
}
 0x247   : > { %s1347_s17 = smov 128   ;;  %s1348_s22 = smov 8  }
 0x248   : > { %1239 = dma.vmem_to_hbm [thread:$0]  (%p1437_p5), %s1012_s25, 2048, %s1014_s28, %s999_s29, %s1347_s17, %s1347_s17, %s1348_s22  }
 0x249 PF: > { %p1245_p4 = scmp.ge.s32.totalorder %s1345_s12, 2  ;;  %s1028_s27 = sand.u32 1, %s1333_s30  }
 0x24a   : > { %s1029_s26 = scalar_lea.sflag [#allocation3], %s1028_s27 }
 0x24b   : > { %p1242_p7 = pnand %p1245_p4, %p1441_p6 }
 0x24d   : > { %p1243_p8 = pneg %p1242_p7 }
 0x24f   : > { %1328 = dma.done.wait (%p1243_p8), %s1029_s26, 2048  }
 0x250   : > { %1330 = vsyncadd (%p1243_p8), %s1029_s26, 4294965248  ;;  %s1691_s16 = sld [smem:[#allocation5_spill]]  ;;  %p19_p9 = scmp.ge.s32.totalorder %s1424_s15, 4  }
 0x251   : > { %s1692_s30 = smov %s1337_s10  ;;  %s1693_s10 = smov %s1341_s11 }
 0x252   : > { %s1695_s12 = smov %s1424_s15  ;;  %21 = sbr.rel (!%p19_p9) target bundleno = 3 (0x3), region = 94 }
 0x256   : > { %s1694_s11 = smov %s1691_s16 }
 0x257   :  { %1035 = vsyncpa [#allocation3], 1 }
 0x258   :  { %1037 = vsyncpa [#allocation3 + $0x1], 1 }

</bundles_post_ra>
